<compile_context>
chip_gen: v6e
topology: v6e:2x2x1
jax: 0.10.0
libtpu: 0.0.40
codegen_flags: <defaults>
</compile_context>

<pallas_src>
import functools

import jax
import jax.numpy as jnp
from jax.experimental import pallas as pl
from jax.experimental.pallas import tpu as pltpu


def projection_kernel(x_ref, w_ref, b_ref, o_ref):
    # x_ref: (tm, H) f32 tile, w_ref: (H, D) f32 (resident), b_ref: (1, D) f32,
    # o_ref: (tm, D) out_dtype.  Cast to bf16 in-register for a full-rate MXU
    # matmul with f32 accumulation; bias add stays f32; single cast at store.
    x = x_ref[...].astype(jnp.bfloat16)
    w = w_ref[...].astype(jnp.bfloat16)
    acc = jnp.dot(x, w, preferred_element_type=jnp.float32)
    o_ref[...] = (acc + b_ref[...]).astype(o_ref.dtype)


def _round_up(x, m):
    return ((x + m - 1) // m) * m


@functools.partial(jax.jit, static_argnames=("tm", "out_dtype"))
def projection(x, w, b, *, tm=2048, out_dtype=jnp.bfloat16):
    """x: (M, H) f32, w: (H, D) f32, b: (1, D) f32 -> (M, D) out_dtype.

    Row-tiled matmul: grid over M only (weight fully resident in VMEM),
    in-kernel bf16 cast with f32 accumulation, ragged last block handled by
    Pallas store masking (no padding copies).
    """
    M, H = x.shape
    D = w.shape[1]

    # Row tile:
    #   - multiple of 16 for small M (bf16 sublane packing),
    #   - large (default 2048) to amortize per-grid-step overhead,
    #   - capped so the grid keeps >= 4 blocks when M is large, so both
    #     v7x TensorCores get row blocks via the "parallel" axis.
    tm_eff = min(tm, _round_up(M, 16), _round_up(pl.cdiv(M, 4), 256))
    grid = (pl.cdiv(M, tm_eff),)

    out_itemsize = jnp.dtype(out_dtype).itemsize
    cost = pl.CostEstimate(
        flops=2 * M * H * D,
        transcendentals=0,
        bytes_accessed=(M * H * x.dtype.itemsize
                        + H * D * w.dtype.itemsize
                        + D * b.dtype.itemsize
                        + M * D * out_itemsize),
    )

    out = pl.pallas_call(
        projection_kernel,
        out_shape=jax.ShapeDtypeStruct((M, D), out_dtype),
        grid_spec=pltpu.PrefetchScalarGridSpec(
            num_scalar_prefetch=0,
            grid=grid,
            in_specs=[
                pl.BlockSpec((tm_eff, H), lambda i: (i, 0)),  # activation row tile
                pl.BlockSpec((H, D), lambda i: (0, 0)),       # weight: resident, DMA'd once
                pl.BlockSpec((1, D), lambda i: (0, 0)),       # bias: resident
            ],
            out_specs=pl.BlockSpec((tm_eff, D), lambda i: (i, 0)),  # lane-dense output
        ),
        compiler_params=pltpu.CompilerParams(
            dimension_semantics=("parallel",)),  # row blocks shard across v7x TCs
        cost_estimate=cost,
    )(x, w, b)

    return out


class TextEmbedderPallas:
    """Pallas equivalent of TextEmbedder.projection applied to encoder output."""

    def __init__(self, hidden_size=128, embedding_dim=256, key=None):
        key = jax.random.PRNGKey(0) if key is None else key
        kw, kb = jax.random.split(key)
        bound = 1.0 / (hidden_size ** 0.5)
        # nn.Linear default init: U(-1/sqrt(H), 1/sqrt(H)) for weight and bias.
        # Stored pre-transposed: (H, D) so the kernel does x @ W + b.
        self.w = jax.random.uniform(
            kw, (hidden_size, embedding_dim), jnp.float32, -bound, bound)
        self.b = jax.random.uniform(
            kb, (1, embedding_dim), jnp.float32, -bound, bound)
        self.hidden_size = hidden_size
        self.embedding_dim = embedding_dim

    def __call__(self, hidden_states, attention_mask, *, out_dtype=jnp.bfloat16):
        # TODO(synk): tokenizer + pretrained ModernBERT encoder have no Pallas
        # equivalent; we take last_hidden_state (B, Nt, H) and attention_mask
        # (B, Nt) as inputs and kernelize only the projection Linear.
        B, Nt, H = hidden_states.shape
        assert H == self.hidden_size
        x = hidden_states.reshape(B * Nt, H)
        feats = projection(x, self.w, self.b, out_dtype=out_dtype)
        return feats.reshape(B, Nt, self.embedding_dim), attention_mask


if __name__ == "__main__":
    # Small shapes consistent with the module: (B, Nt, hidden) -> (B, Nt, D).
    B, Nt, H, D = 2, 8, 128, 256

    root = jax.random.PRNGKey(0)
    k_hid, k_params = jax.random.split(root)

    # Synthetic "last_hidden_state" standing in for the pretrained encoder output.
    hidden_states = jax.random.normal(k_hid, (B, Nt, H), dtype=jnp.float32)
    # Synthetic attention mask with ragged lengths (like padded tokenization).
    lengths = jnp.array([Nt, Nt - 3], dtype=jnp.int32)
    attention_mask = (jnp.arange(Nt)[None, :] < lengths[:, None]).astype(jnp.int32)

    model = TextEmbedderPallas(hidden_size=H, embedding_dim=D, key=k_params)

    features, mask_out = model(hidden_states, attention_mask)
    features = jax.block_until_ready(features)
    mask_out = jax.block_until_ready(mask_out)

    assert features.shape == (B, Nt, D)
    assert features.dtype == jnp.bfloat16
    assert mask_out.shape == (B, Nt)

    feats_f32 = features.astype(jnp.float32)
    x2d = hidden_states.reshape(B * Nt, H)

    # Reference 1: same bf16-input / f32-accumulate / bf16-output recipe.
    ref = (x2d.astype(jnp.bfloat16).astype(jnp.float32)
           @ model.w.astype(jnp.bfloat16).astype(jnp.float32)) + model.b
    ref_q = ref.astype(jnp.bfloat16).astype(jnp.float32).reshape(B, Nt, D)
    assert jnp.allclose(feats_f32, ref_q, atol=2e-2, rtol=2e-2)

    # Reference 2: pure f32 math (looser tolerance: bf16 in/out quantization).
    ref_f32 = (x2d @ model.w + model.b).reshape(B, Nt, D)
    assert jnp.allclose(feats_f32, ref_f32, atol=5e-2, rtol=5e-2)

    assert jnp.array_equal(mask_out, attention_mask)

    print("KERNEL_OK")
</pallas_src>

<mosaic_0001>
module attributes {stable_mosaic.version = 11 : i64} {
  func.func @projection_kernel(%arg0: i32, %arg1: memref<16x128xf32, #tpu.memory_space<vmem>>, %arg2: memref<128x256xf32, #tpu.memory_space<vmem>>, %arg3: memref<1x256xf32, #tpu.memory_space<vmem>>, %arg4: memref<16x256xbf16, #tpu.memory_space<vmem>>) attributes {dimension_semantics = [#tpu.dimension_semantics<parallel>], iteration_bounds = array<i64: 1>, scalar_prefetch = 0 : i64, scratch_operands = 0 : i64, tpu.core_type = #tpu.core_type<tc>, window_params = [{transform_indices = @transform_0, window_bounds = array<i64: 16, 128>}, {pipeline_mode = #tpu.pipeline_mode<synchronous>, transform_indices = @transform_1, window_bounds = array<i64: 128, 256>}, {pipeline_mode = #tpu.pipeline_mode<synchronous>, transform_indices = @transform_2, window_bounds = array<i64: 1, 256>}, {transform_indices = @transform_3, window_bounds = array<i64: 16, 256>}]} {
    %c0 = arith.constant 0 : index
    %c0_0 = arith.constant 0 : index
    %0 = vector.load %arg1[%c0, %c0_0] : memref<16x128xf32, #tpu.memory_space<vmem>>, vector<16x128xf32>
    %1 = arith.truncf %0 : vector<16x128xf32> to vector<16x128xbf16>
    %c0_1 = arith.constant 0 : index
    %c0_2 = arith.constant 0 : index
    %2 = vector.load %arg2[%c0_1, %c0_2] : memref<128x256xf32, #tpu.memory_space<vmem>>, vector<128x256xf32>
    %3 = arith.truncf %2 : vector<128x256xf32> to vector<128x256xbf16>
    %cst = arith.constant dense<0.000000e+00> : vector<16x256xf32>
    %4 = tpu.matmul %1, %3, %cst {dimension_numbers = #tpu.dot_dimension_numbers<[1], [0], [0], [1], [0, 0, 1, 1], [], []>} : vector<16x128xbf16>, vector<128x256xbf16>, vector<16x256xf32> -> vector<16x256xf32>
    %c0_3 = arith.constant 0 : index
    %c0_4 = arith.constant 0 : index
    %5 = vector.load %arg3[%c0_3, %c0_4] : memref<1x256xf32, #tpu.memory_space<vmem>>, vector<1x256xf32>
    %6 = vector.broadcast %5 : vector<1x256xf32> to vector<16x256xf32>
    %7 = arith.addf %4, %6 : vector<16x256xf32>
    %8 = arith.truncf %7 : vector<16x256xf32> to vector<16x256xbf16>
    %c0_5 = arith.constant 0 : index
    %c0_6 = arith.constant 0 : index
    %9 = vector.load %arg4[%c0_5, %c0_6] : memref<16x256xbf16, #tpu.memory_space<vmem>>, vector<16x256xbf16>
    tpu.vector_store %arg4[%c0_5, %c0_6], %8 {strides = array<i32>} : memref<16x256xbf16, #tpu.memory_space<vmem>>, vector<16x256xbf16>,
    return
  }
  func.func @transform_0(%arg0: i32) -> (i32, i32) {
    %c0_i32 = arith.constant 0 : i32
    %c0_i32_0 = arith.constant 0 : i32
    return %arg0, %c0_i32 : i32, i32
  }
  func.func @transform_1(%arg0: i32) -> (i32, i32) {
    %c0_i32 = arith.constant 0 : i32
    %c0_i32_0 = arith.constant 0 : i32
    %c0_i32_1 = arith.constant 0 : i32
    return %c0_i32, %c0_i32_0 : i32, i32
  }
  func.func @transform_2(%arg0: i32) -> (i32, i32) {
    %c0_i32 = arith.constant 0 : i32
    %c0_i32_0 = arith.constant 0 : i32
    %c0_i32_1 = arith.constant 0 : i32
    return %c0_i32, %c0_i32_0 : i32, i32
  }
  func.func @transform_3(%arg0: i32) -> (i32, i32) {
    %c0_i32 = arith.constant 0 : i32
    %c0_i32_0 = arith.constant 0 : i32
    return %arg0, %c0_i32 : i32, i32
  }
}

</mosaic_0001>

<bundles_post_ra>
// kernel: projection.1
= control target key start
LH: loop header
LB: loop body
LE: loop exit
PB: predicated region body
PF: predicated region fallthrough
CT: control target
= control target key end

     0   :  { %8 = vsyncpa [#allocation3], 0  ;;  %s306_s0 = inlined_call_operand.hbm [shape: f32[16,128], index: 0, kind: input, shape index: {}]   ;;  %s307_s1 = inlined_call_operand.hbm [shape: f32[128,256], index: 1, kind: input, shape index: {}]   ;;  %s308_s2 = inlined_call_operand.vmem [shape: f32[1,256], index: 2, kind: input, shape index: {}]   ;;  %s309_s3 = inlined_call_operand.hbm [shape: bf16[16,256], index: 3, kind: output, shape index: {}]  }
   0x1   :  { %9 = vsyncpa [#allocation6], 0 }
   0x2   :  { %10 = vsyncpa [#allocation4], 0  ;;  %s260_s12 = smov [#allocation2]  }
   0x3   :  { %s16_s13 = sshll.u32 %s260_s12, 4  ;;  %s17_s13 = int_to_ptr.vmem [resolvable:$true] %s16_s13 }
   0x4   :  { %s202_s14 = scalar_lea.vmem %s17_s13, 256  ;;  %p207_p1 = scmp.lt.s32.totalorder %s17_s13, %s17_s13 }
   0x5   :  { %p203_p0 = scmp.ne.s32.totalorder %s17_s13, %s202_s14  ;;  %p208_p2 = scmp.lt.s32.totalorder %s202_s14, %s202_s14 }
   0x7   :  { %p209_p3 = por %p208_p2, %p207_p1 }
   0x9   :  { %p210_p4 = pnand %p209_p3, %p203_p0 }
   0xb   :  { %213 = shalt.err (!%p210_p4)
}
   0xc   :  { %s261_s15 = smov 128   ;;  %s262_s16 = smov 8  }
   0xd   :  { %22 = dma.hbm_to_vmem [thread:$0]  %s306_s0, 256, %s17_s13, [#allocation3], %s261_s15, %s261_s15, %s262_s16  }
   0xe   :  { %s263_s19 = smov [#allocation5]  }
   0xf   :  { %s28_s20 = sshll.u32 %s263_s19, 4  ;;  %s29_s20 = int_to_ptr.vmem [resolvable:$true] %s28_s20 }
  0x10   :  { %s222_s21 = scalar_lea.vmem %s29_s20, 4096  ;;  %p227_p6 = scmp.lt.s32.totalorder %s29_s20, %s29_s20 }
  0x11   :  { %p223_p5 = scmp.ne.s32.totalorder %s29_s20, %s222_s21  ;;  %p228_p7 = scmp.lt.s32.totalorder %s222_s21, %s222_s21 }
  0x13   :  { %p229_p8 = por %p228_p7, %p227_p6 }
  0x15   :  { %p230_p9 = pnand %p229_p8, %p223_p5 }
  0x17   :  { %233 = shalt.err (!%p230_p9)
}
  0x18   :  { %s264_s22 = smov 256   ;;  %s265_s23 = smov 16  }
  0x19   :  { %34 = dma.hbm_to_vmem [thread:$0]  %s307_s1, 4096, %s29_s20, [#allocation6], %s264_s22, %s264_s22, %s265_s23  }
  0x1a   :  { %254 = dma.done.wait [#allocation3], 256  }
  0x1b   :  { %255 = vsyncadd [#allocation3], 4294967040 }
  0x1c   :  { %256 = dma.done.wait [#allocation6], 4096  }
  0x1d   :  { %257 = vsyncadd [#allocation6], 4294963200  ;;  %v266_v0 = vmov 0   ;;  %v76_v1 = vld [vmem:[#allocation5 + $0xe8] sm:$0xff]  ;;  %v78_v2 = vld [vmem:[#allocation5 + $0xf8] sm:$0xff]  ;;  %v97_v52 = vlaneseq  ;;  %s267_s26 = smov [#allocation7]  }
  0x1e   :  { %139 = vmatprep.mubr.bf16.mxu0 %v266_v0  ;;  %v75_v3 = vld [vmem:[#allocation5 + $0xe0] sm:$0xff]  ;;  %v94_v4 = vpack.c.bf16 %v78_v2, %v76_v1  ;;  %v77_v5 = vld [vmem:[#allocation5 + $0xf0] sm:$0xff]  ;;  %v72_v6 = vld [vmem:[#allocation5 + $0xc8] sm:$0xff]  ;;  %s169_s27 = sshll.u32 %s267_s26, 4  ;;  %s170_s27 = int_to_ptr.vmem [resolvable:$true] %s169_s27 }
  0x1f   :  { %v74_v7 = vld [vmem:[#allocation5 + $0xd8] sm:$0xff]  ;;  %v93_v8 = vpack.c.bf16 %v77_v5, %v75_v3  ;;  %v71_v10 = vld [vmem:[#allocation5 + $0xc0] sm:$0xff]  ;;  %v73_v11 = vld [vmem:[#allocation5 + $0xd0] sm:$0xff]  ;;  %v98_v53 = vshrl.u32 %v97_v52, 7  ;;  %s234_s28 = scalar_lea.vmem %s170_s27, 256  ;;  %p239_p11 = scmp.lt.s32.totalorder %s170_s27, %s170_s27 }
  0x20   :  { %v92_v9 = vpack.c.bf16 %v74_v7, %v72_v6  ;;  %v68_v12 = vld [vmem:[#allocation5 + $0xa8] sm:$0xff]  ;;  %107 = vmatprep.subr.bf16.mxu0 %v94_v4  ;;  %v70_v13 = vld [vmem:[#allocation5 + $0xb8] sm:$0xff]  ;;  %v91_v14 = vpack.c.bf16 %v73_v11, %v71_v10  ;;  %v67_v16 = vld [vmem:[#allocation5 + $0xa0] sm:$0xff]  ;;  %p235_p10 = scmp.ne.s32.totalorder %s170_s27, %s234_s28  ;;  %p240_p12 = scmp.lt.s32.totalorder %s234_s28, %s234_s28 }
  0x21   :  { %108 = vmatpush1.bf16.msra.mxu0 %v93_v8  ;;  %v90_v15 = vpack.c.bf16 %v70_v13, %v68_v12  ;;  %v69_v17 = vld [vmem:[#allocation5 + $0xb0] sm:$0xff]  ;;  %v64_v18 = vld [vmem:[#allocation5 + $0x88] sm:$0xff]  ;;  %v66_v19 = vld [vmem:[#allocation5 + $0x98] sm:$0xff]  ;;  %v99_v54 = vsub.s32 0, %v98_v53  ;;  %v103_v55 = vsub.s32 1, %v98_v53 }
  0x22   :  { %109 = vmatprep.subr.bf16.mxu0 %v92_v9  ;;  %v89_v20 = vpack.c.bf16 %v69_v17, %v67_v16  ;;  %v88_v21 = vpack.c.bf16 %v66_v19, %v64_v18  ;;  %v63_v22 = vld [vmem:[#allocation5 + $0x80] sm:$0xff]  ;;  %v65_v23 = vld [vmem:[#allocation5 + $0x90] sm:$0xff]  ;;  %v60_v24 = vld [vmem:[#allocation5 + $0x68] sm:$0xff]  ;;  %p241_p13 = por %p240_p12, %p239_p11 }
  0x23   :  { %v62_v25 = vld [vmem:[#allocation5 + $0x78] sm:$0xff]  ;;  %v87_v26 = vpack.c.bf16 %v65_v23, %v63_v22  ;;  %v59_v28 = vld [vmem:[#allocation5 + $0x60] sm:$0xff]  ;;  %v61_v29 = vld [vmem:[#allocation5 + $0x70] sm:$0xff] }
  0x24   :  { %v86_v27 = vpack.c.bf16 %v62_v25, %v60_v24  ;;  %v56_v30 = vld [vmem:[#allocation5 + $0x48] sm:$0xff]  ;;  %v58_v31 = vld [vmem:[#allocation5 + $0x58] sm:$0xff]  ;;  %v85_v32 = vpack.c.bf16 %v61_v29, %v59_v28  ;;  %v55_v34 = vld [vmem:[#allocation5 + $0x40] sm:$0xff]  ;;  %p242_p0 = pnand %p241_p13, %p235_p10 }
  0x25   :  { %110 = vmatpush1.bf16.msra.mxu0 %v91_v14  ;;  %v84_v33 = vpack.c.bf16 %v58_v31, %v56_v30  ;;  %v57_v35 = vld [vmem:[#allocation5 + $0x50] sm:$0xff]  ;;  %v52_v36 = vld [vmem:[#allocation5 + $0x28] sm:$0xff]  ;;  %v54_v37 = vld [vmem:[#allocation5 + $0x38] sm:$0xff] }
  0x26   :  { %111 = vmatprep.subr.bf16.mxu0 %v90_v15  ;;  %v83_v38 = vpack.c.bf16 %v57_v35, %v55_v34  ;;  %v82_v39 = vpack.c.bf16 %v54_v37, %v52_v36  ;;  %v51_v40 = vld [vmem:[#allocation5 + $0x20] sm:$0xff]  ;;  %v53_v41 = vld [vmem:[#allocation5 + $0x30] sm:$0xff]  ;;  %v48_v42 = vld [vmem:[#allocation5 + $0x8] sm:$0xff] }
  0x27   :  { %v50_v43 = vld [vmem:[#allocation5 + $0x18] sm:$0xff]  ;;  %v81_v44 = vpack.c.bf16 %v53_v41, %v51_v40  ;;  %v47_v46 = vld [vmem:[#allocation5] sm:$0xff]  ;;  %v49_v47 = vld [vmem:[#allocation5 + $0x10] sm:$0xff] }
  0x28   :  { %v80_v45 = vpack.c.bf16 %v50_v43, %v48_v42  ;;  %v79_v48 = vpack.c.bf16 %v49_v47, %v47_v46  ;;  %v44_v49 = vld [vmem:[#allocation2] sm:$0xff]  ;;  %v45_v50 = vld [vmem:[#allocation2 + $0x8] sm:$0xff] }
  0x29   :  { %112 = vmatpush1.bf16.msra.mxu0 %v89_v20  ;;  %v46_v51 = vpack.c.bf16 %v45_v50, %v44_v49  ;;  %v95_v56 = vld [vmem:[%s308_s2] sm:$0x3] }
  0x2a   :  { %113 = vmatprep.subr.bf16.mxu0 %v88_v21  ;;  %v100_v57 = vrot.slane %v95_v56, %v99_v54  ;;  %v104_v58 = vrot.slane %v95_v56, %v103_v55 }
  0x2d   :  { %114 = vmatpush1.bf16.msra.mxu0 %v87_v26 }
  0x2e   :  { %115 = vmatprep.subr.bf16.mxu0 %v86_v27 }
  0x31   :  { %116 = vmatpush1.bf16.msra.mxu0 %v85_v32 }
  0x32   :  { %117 = vmatprep.subr.bf16.mxu0 %v84_v33 }
  0x35   :  { %118 = vmatpush1.bf16.msra.mxu0 %v83_v38 }
  0x36   :  { %119 = vmatprep.subr.bf16.mxu0 %v82_v39 }
  0x39   :  { %120 = vmatpush1.bf16.msra.mxu0 %v81_v44 }
  0x3a   :  { %121 = vmatprep.subr.bf16.mxu0 %v80_v45 }
  0x3d   :  { %122 = vmatpush1.bf16.msra.mxu0 %v79_v48 }
  0x40   :  { %140 = vmatmul.mubr.bf16.vlgmr.msra.gmra.mxu0 %v46_v51 }
 0x100   :  { %v141_v59 = vpop.f32.mrf.mxu0 }
 0x101   :  { %v142_v61 = vadd.f32 %v141_v59, %v100_v57 }
 0x102   :  { %v143_v60 = vpop.f32.mrf.mxu0 }
 0x103   :  { %v144_v62 = vadd.f32 %v143_v60, %v104_v58 }
 0x104   :  { %v145_v63 = vpop.f32.mrf.mxu0 }
 0x105   :  { %v184_v0 = vpack.c.bf16 %v144_v62, %v142_v61  ;;  %v146_v2 = vadd.f32 %v145_v63, %v100_v57 }
 0x106   :  { %v147_v1 = vpop.f32.mrf.mxu0 }
 0x107   :  { %162 = vst [vmem:[#allocation7] sm:$0xff] %v184_v0  ;;  %v148_v3 = vadd.f32 %v147_v1, %v104_v58 }
 0x109   :  { %v185_v4 = vpack.c.bf16 %v148_v3, %v146_v2 }
 0x10b   :  { %163 = vst [vmem:[#allocation7 + $0x8] sm:$0xff] %v185_v4 }
 0x10c   :  { %245 = shalt.err (!%p242_p0)
}
 0x10d   :  { %175 = dma.vmem_to_hbm [thread:$0]  %s170_s27, 256, %s309_s3, [#allocation4], %s261_s15, %s261_s15, %s262_s16  }
 0x10e   :  { %258 = dma.done.wait [#allocation4], 256  }
 0x10f   :  { %259 = vsyncadd [#allocation4], 4294967040 }
 0x110   :  { %179 = vsyncpa [#allocation3], 1 }
 0x111   :  { %180 = vsyncpa [#allocation6], 1 }
 0x112   :  { %181 = vsyncpa [#allocation4], 1 }

</bundles_post_ra>
